<compile_context>
chip_gen: v7x
topology: tpu7x:2x2x1
jax: 0.10.0
libtpu: 0.0.40
codegen_flags: <defaults>
</compile_context>

<pallas_src>
import functools

import jax
import jax.numpy as jnp
from jax.experimental import pallas as pl
from jax.experimental.pallas import tpu as pltpu


def _round_up(x, m):
    return ((x + m - 1) // m) * m


# ---------------------------------------------------------------------------
# Tiny-input fast path: single invocation, full-extent (unpadded) blocks.
# ---------------------------------------------------------------------------
def _poly_small_kernel(sigma_ref, x_ref, o_ref, *, order, normalize):
    x = x_ref[...].astype(jnp.float32)                        # (D, N)
    if normalize:
        # Fold per-column rsqrt into the columns; zero columns give inf/NaN,
        # matching the torch reference.
        ssq = jnp.sum(x * x, axis=0, keepdims=True)           # (1, N)
        x = x * jax.lax.rsqrt(ssq)
    k = jax.lax.dot_general(x, x, (((0,), (0,)), ((), ())),
                            preferred_element_type=jnp.float32)  # (N, N)
    if order != 1:
        k = k ** order
    if normalize:
        s = sigma_ref[0]
        k = k * (s * s)
    o_ref[...] = k


def _poly_small(xs, sigma_arr, order, normalize):
    _, N = xs.shape
    return pl.pallas_call(
        functools.partial(_poly_small_kernel, order=order, normalize=normalize),
        out_shape=jax.ShapeDtypeStruct((N, N), jnp.float32),
        in_specs=[pl.BlockSpec(memory_space=pltpu.MemorySpace.SMEM),
                  pl.BlockSpec(memory_space=pltpu.MemorySpace.VMEM)],
        out_specs=pl.BlockSpec(memory_space=pltpu.MemorySpace.VMEM),
    )(sigma_arr, xs)


# ---------------------------------------------------------------------------
# General tiled path: upper-triangular tile pairs x K reduction.
# ---------------------------------------------------------------------------
def _poly_tile_kernel(sigma_ref, ti_ref, tj_ref, lhs_ref, rhs_ref, o_ref, *,
                      order, apply_sigma, tk, lhs_resident):
    del ti_ref, tj_ref  # only used by the index_maps
    k = pl.program_id(1)

    @pl.when(k == 0)
    def _():
        o_ref[...] = jnp.zeros_like(o_ref)

    if lhs_resident:
        a = lhs_ref[:, pl.ds(pl.multiple_of(k * tk, tk), tk)]
    else:
        a = lhs_ref[...]
    # f32 accumulation directly into the resident output tile.
    o_ref[...] += jnp.dot(a, rhs_ref[...], preferred_element_type=jnp.float32)

    if order != 1 or apply_sigma:
        @pl.when(k == pl.num_programs(1) - 1)
        def _():
            r = o_ref[...]
            if order != 1:                      # static int -> integer_pow (VPU)
                r = r ** order
            if apply_sigma:
                s = sigma_ref[0]
                r = r * (s * s)
            o_ref[...] = r


def poly_kernel(xs, sigma_f, *, order=1, normalize=False,
                use_bf16_operands=False):
    """xs: (D, N) float; sigma_f: scalar float. Returns (N, N) float32.

    use_bf16_operands=True runs the MXU on bf16 operands with f32 accumulation
    (peak-throughput path on v5e/v6e/v7x, half the input DMA bytes) at ~1e-2
    relative accuracy; default False keeps fp32 parity with the torch module.
    """
    D, N = xs.shape
    xs = xs.astype(jnp.float32)
    sigma_arr = jnp.asarray(sigma_f, jnp.float32).reshape((1,))

    # Tiny inputs (FedCor defaults): pad/transpose/slice wrapper passes cost
    # more than the single-tile kernel itself -> unpadded single-shot path.
    if N <= 128 and D <= 2048:
        return _poly_small(xs, sigma_arr, order, normalize)

    # Fold normalization into xs (one rsqrt over (N,), in f32, before any cast):
    # Gram of the scaled matrix is already the normalized kernel matrix.
    if normalize:
        inv = jax.lax.rsqrt(jnp.sum(xs * xs, axis=0))          # (N,)
        xs = xs * inv[None, :]

    # Output tiling: lane-dense 128-multiples, preferring bigger tiles when they
    # add no extra padding (higher arithmetic intensity, fewer grid steps).
    n_pad = _round_up(N, 128)
    tm = 128
    for t in (512, 256):
        if n_pad % t == 0:
            tm = t
            break
    tn = tm
    T = n_pad // tm

    # Contraction tiling: single full-depth K block for small/medium D, else
    # 512-deep tiles (multiple of the 256-deep v6e/v7x MXU and of 128 for v5e).
    if D <= 1024:
        d_pad = _round_up(D, 8)
        tk = d_pad
    else:
        tk = 512
        d_pad = _round_up(D, tk)
    kt = d_pad // tk

    op_dtype = jnp.bfloat16 if use_bf16_operands else jnp.float32
    op_bytes = 2 if use_bf16_operands else 4

    x_p = jnp.pad(xs, ((0, d_pad - D), (0, n_pad - N))).astype(op_dtype)  # RHS (d_pad, n_pad)
    xt_p = x_p.T                                                          # LHS (n_pad, d_pad)

    # Keep the LHS row panel resident over the tj sweep when it fits the budget.
    lhs_resident = (kt > 1) and (2 * tm * d_pad * op_bytes <= 24 * 1024 * 1024)

    # Upper-triangular tile pairs, row-major so ti (and the resident LHS panel)
    # is constant over each run of tj.
    pairs = [(i, j) for i in range(T) for j in range(i, T)]
    ti_idx = jnp.asarray([p[0] for p in pairs], jnp.int32)
    tj_idx = jnp.asarray([p[1] for p in pairs], jnp.int32)

    if lhs_resident:
        lhs_spec = pl.BlockSpec((tm, d_pad), lambda p, k, sig, ti, tj: (ti[p], 0))
        lhs_bytes = 2 * tm * d_pad * op_bytes
    else:
        lhs_spec = pl.BlockSpec((tm, tk), lambda p, k, sig, ti, tj: (ti[p], k))
        lhs_bytes = 2 * tm * tk * op_bytes
    rhs_spec = pl.BlockSpec((tk, tn), lambda p, k, sig, ti, tj: (k, tj[p]))
    out_spec = pl.BlockSpec((tm, tn), lambda p, k, sig, ti, tj: (ti[p], tj[p]))

    # Double-buffered inputs + resident f32 output tile; cap at v7x's 64 MiB.
    vmem_need = lhs_bytes + 2 * tk * tn * op_bytes + 2 * tm * tn * 4
    cparams = pltpu.CompilerParams(
        dimension_semantics=("parallel", "arbitrary"),
        vmem_limit_bytes=min(vmem_need + (16 << 20), 64 << 20),
    )

    body = functools.partial(_poly_tile_kernel, order=order,
                             apply_sigma=normalize, tk=tk,
                             lhs_resident=lhs_resident)

    out_p = pl.pallas_call(
        body,
        out_shape=jax.ShapeDtypeStruct((n_pad, n_pad), jnp.float32),
        grid_spec=pltpu.PrefetchScalarGridSpec(
            num_scalar_prefetch=3,                 # sigma, tile_i, tile_j -> SMEM
            grid=(len(pairs), kt),
            in_specs=[lhs_spec, rhs_spec],
            out_specs=out_spec,
        ),
        compiler_params=cparams,
    )(sigma_arr, ti_idx, tj_idx, xt_p, x_p)

    if T > 1:
        # Mirror the computed upper-triangular tiles into the (never visited)
        # lower-triangular tiles; pow/sigma are elementwise so symmetry holds.
        r = jnp.arange(n_pad, dtype=jnp.int32) // tm
        upper = r[:, None] <= r[None, :]
        out_p = jnp.where(upper, out_p, out_p.T)

    return out_p[:N, :N]


def _reference(xs, sigma_f, order, normalize):
    k = jnp.matmul(xs.T, xs, precision=jax.lax.Precision.HIGHEST)
    if normalize:
        ssq = jnp.sum(xs ** 2, axis=0, keepdims=True)
        k = k / jnp.sqrt(ssq) / jnp.sqrt(ssq.T)
        return (k ** order) * sigma_f ** 2
    return k ** order


if __name__ == "__main__":
    key = jax.random.PRNGKey(0)
    k1, k2, k3 = jax.random.split(key, 3)

    # --- Test 1: FedCor-default-ish tiny shapes (D=32 features, N=8 samples) ---
    # Hits the unpadded single-tile fast path.
    D1, N1 = 32, 8
    xs1 = jax.random.normal(k1, (D1, N1), dtype=jnp.float32)
    sigma1 = jnp.float32(1.0)   # Parameter(torch.tensor(1.0)) deterministic init

    out1_plain = poly_kernel(xs1, sigma1, order=1, normalize=False)
    out1_norm = poly_kernel(xs1, sigma1, order=2, normalize=True)
    jax.block_until_ready((out1_plain, out1_norm))
    assert jnp.allclose(out1_plain, _reference(xs1, sigma1, 1, False),
                        atol=1e-4, rtol=1e-4)
    assert jnp.allclose(out1_norm, _reference(xs1, sigma1, 2, True),
                        atol=1e-4, rtol=1e-4)

    # --- Test 2: multi-tile upper-triangular grid (T=3), single-depth K. ---
    D2, N2 = 600, 300
    xs2 = jax.random.normal(k2, (D2, N2), dtype=jnp.float32)
    sigma2 = jnp.float32(0.75)

    out2_plain = poly_kernel(xs2, sigma2, order=1, normalize=False)
    out2_norm = poly_kernel(xs2, sigma2, order=1, normalize=True)
    jax.block_until_ready((out2_plain, out2_norm))
    assert jnp.allclose(out2_plain, _reference(xs2, sigma2, 1, False),
                        atol=1e-2, rtol=1e-2)
    assert jnp.allclose(out2_norm, _reference(xs2, sigma2, 1, True),
                        atol=1e-2, rtol=1e-2)

    # --- Test 3: multi-step K reduction with resident LHS panel + mirror,
    #             plus the bf16-operand path. ---
    D3, N3 = 1280, 384
    xs3 = jax.random.normal(k3, (D3, N3), dtype=jnp.float32)
    sigma3 = jnp.float32(1.25)

    out3_norm = poly_kernel(xs3, sigma3, order=1, normalize=True)
    out3_bf16 = poly_kernel(xs3, sigma3, order=1, normalize=True,
                            use_bf16_operands=True)
    jax.block_until_ready((out3_norm, out3_bf16))
    ref3 = _reference(xs3, sigma3, 1, True)
    assert jnp.allclose(out3_norm, ref3, atol=1e-2, rtol=1e-2)
    assert jnp.allclose(out3_bf16, ref3, atol=1e-1, rtol=1e-1)

    print("KERNEL_OK")
</pallas_src>

<mosaic_0001>
module attributes {stable_mosaic.version = 11 : i64} {
  func.func @_poly_small_kernel(%arg0: memref<1xf32, #tpu.memory_space<smem>>, %arg1: memref<32x8xf32, #tpu.memory_space<vmem>>, %arg2: memref<8x8xf32, #tpu.memory_space<vmem>>) attributes {dimension_semantics = [], scalar_prefetch = 0 : i64, scratch_operands = 0 : i64, tpu.core_type = #tpu.core_type<tc>} {
    %c0 = arith.constant 0 : index
    %c0_0 = arith.constant 0 : index
    %0 = vector.load %arg1[%c0, %c0_0] : memref<32x8xf32, #tpu.memory_space<vmem>>, vector<32x8xf32>
    %cst = arith.constant dense<0.000000e+00> : vector<8x8xf32>
    %1 = tpu.matmul %0, %0, %cst {dimension_numbers = #tpu.dot_dimension_numbers<[0], [0], [1], [1], [0, 1, 1, 1], [], []>} : vector<32x8xf32>, vector<32x8xf32>, vector<8x8xf32> -> vector<8x8xf32>
    %c0_1 = arith.constant 0 : index
    %c0_2 = arith.constant 0 : index
    %2 = vector.load %arg2[%c0_1, %c0_2] : memref<8x8xf32, #tpu.memory_space<vmem>>, vector<8x8xf32>
    tpu.vector_store %arg2[%c0_1, %c0_2], %1 {strides = array<i32>} : memref<8x8xf32, #tpu.memory_space<vmem>>, vector<8x8xf32>,
    return
  }
}

</mosaic_0001>

<bundles_post_ra>
// kernel: tpu_custom_call.1
= control target key start
LH: loop header
LB: loop body
LE: loop exit
PB: predicated region body
PF: predicated region fallthrough
CT: control target
= control target key end

     0   :  { %v190_v2 = vmov 0.0|0.0   ;;  %s233_s0 = inlined_call_operand.<no memory space> [shape: f32[1], index: 0, kind: input, shape index: {}]   ;;  %s234_s1 = inlined_call_operand.vmem [shape: f32[32,8], index: 1, kind: input, shape index: {}]   ;;  %s235_s2 = inlined_call_operand.hbm [shape: f32[8,8], index: 2, kind: output, shape index: {}]  }
   0x1   :  { %v13_v0 = vld [vmem:[%s234_s1] sm:$0xff]  ;;  %v14_v1 = vld [vmem:[%s234_s1 + $0x8] sm:$0xff]  ;;  %156 = vmatprep.subr.bf16.mxu0 %v190_v2 }
   0x2   :  { %17 = vxpose.xlu0.b32.start [1/4] (short) (narrow) %v13_v0, 8  ;;  %v157_v3 = vpack.c.bf16 %v14_v1, %v13_v0 }
   0x3   :  { %8 = vsyncpa [#allocation4], 0  ;;  %v15_v4 = vld [vmem:[%s234_s1 + $0x10] sm:$0xff]  ;;  %v16_v5 = vld [vmem:[%s234_s1 + $0x18] sm:$0xff]  ;;  %vm191_vm0 = vmmov 0   ;;  %v192_v6 = vmov 0.0  }
   0x4   :  { %153 = vmatprep.mubr.msk.f32.mxu0 %vm191_vm0, %v192_v6  ;;  %v160_v7 = vpack.c.bf16 %v16_v5, %v15_v4  ;;  %158 = vmatpush3.bf16.msra.mxu0 %v157_v3  ;;  %vm49_vm1 = vcmask 261120   ;;  %s193_s16 = smov [#allocation3]   ;;  %vm123_vm2 = vcmask 64512  }
   0x5   :  { %159 = vmatprep.subr.bf16.mxu0 %v190_v2  ;;  %s131_s17 = sshll.u32 %s193_s16, 4  ;;  %s132_s17 = int_to_ptr.vmem [resolvable:$true] %s131_s17 }
   0x6   :  { %18 = vxpose.xlu0.b32.cont [2/4] (short) (narrow) %v14_v1, 8  ;;  %s166_s1 = scalar_lea.vmem %s132_s17, 128  ;;  %p171_p1 = scmp.lt.s32.totalorder %s132_s17, %s132_s17 }
   0x7   :  { %p167_p0 = scmp.ne.s32.totalorder %s132_s17, %s166_s1  ;;  %p172_p2 = scmp.lt.s32.totalorder %s166_s1, %s166_s1 }
   0x8   :  { %161 = vmatpush3.bf16.msra.mxu0 %v160_v7 }
   0x9   :  { %p173_p3 = por %p172_p2, %p171_p1 }
   0xa   :  { %19 = vxpose.xlu0.b32.cont [3/4] (short) (narrow) %v15_v4, 8 }
   0xb   :  { %p174_p4 = pnand %p173_p3, %p167_p0 }
   0xe   :  { %20 = vxpose.xlu0.b32.end [4/4] (short) (narrow) %v16_v5, 8 }
  0x82   :  { %v33_v8 = vpop.trf.xlu0 }
  0x83   :  { %154 = vmatmul.mubr.msk.f32.vlgmr.msra.gmra.mrb[0].mxu0 %vm49_vm1, %v33_v8 }
 0x156   :  { %v119_v9 = vpop.f32.mrb[0].mxu0 }
 0x157   :  { %124 = vst.msk [vmem:[#allocation3] sm:$0xff] %vm123_vm2, %v119_v9  ;;  %v155_v10 = vpop.f32.mrb[1].mxu0 }
 0x158   :  { %177 = shalt.err (!%p174_p4)
}
 0x159   :  { %s178_s20 = scalar_lea.hbm %s235_s2, 128 }
 0x15a   :  { %p179_p5 = scmp.ne.s32.totalorder %s235_s2, %s178_s20  ;;  %p182_p6 = scmp.lt.u32.totalorder %s178_s20, %s235_s2 }
 0x15c   :  { %p184_p7 = pnand %p182_p6, %p179_p5 }
 0x15e   :  { %187 = shalt.err (!%p184_p7)
}
 0x15f   :  { %134 = dma.vmem_to_hbm [thread:$0]  %s132_s17, 128, %s235_s2, [#allocation4]  }
 0x160   :  { %188 = dma.done.wait [#allocation4], 128  }
 0x161   :  { %189 = vsyncadd [#allocation4], 4294967168 }
 0x162   :  { %138 = vsyncpa [#allocation4], 1 }

</bundles_post_ra>
